<compile_context>
chip_gen: v7x
topology: tpu7x:2x2x1
jax: 0.10.0
libtpu: 0.0.40
codegen_flags: <defaults>
</compile_context>

<pallas_src>
import functools

import jax
import jax.numpy as jnp
from jax.experimental import pallas as pl
from jax.experimental.pallas import tpu as pltpu


def _round_up(x, m):
    return ((x + m - 1) // m) * m


def _vmem_limit_bytes():
    """Conservative per-generation scoped-VMEM budget."""
    try:
        kind = jax.devices()[0].device_kind.lower()
    except Exception:
        kind = ""
    if ("v5" in kind) or ("v6" in kind):
        return 100 * 1024 * 1024   # 128 MiB parts: big tiles amortize per-step overhead
    return 56 * 1024 * 1024        # v7x (64 MiB VMEM) and unknown parts: stay under 64 MiB


def _csmgc_kernel(xr_ref, xi_ref, w_ref, b_ref, out_ref, *, n_class):
    """xr/xi: [TN, F]; w: [F, 2*Cp] = [Wr^T | Wi^T]; b: [1, 2*Cp] = [br | bi]; out: [TN, Cp]."""
    cp = out_ref.shape[-1]

    # Two MXU matmuls against the shared packed weight (f32 accumulation).
    prod_r = jnp.dot(xr_ref[...], w_ref[...], preferred_element_type=jnp.float32)
    prod_i = jnp.dot(xi_ref[...], w_ref[...], preferred_element_type=jnp.float32)
    prod_r = prod_r + b_ref[...].astype(jnp.float32)     # adds [br | bi]

    # Complex combine; slices are lane-aligned (cp is a multiple of 128).
    yr = prod_r[:, :cp] - prod_i[:, cp:]                  # xr@Wr^T + br - xi@Wi^T
    yi = prod_r[:, cp:] + prod_i[:, :cp]                  # xr@Wi^T + bi + xi@Wr^T

    # Modulus.  TODO(synk): switch to a scaled hypot if |y| can approach f32 overflow.
    mod = jnp.sqrt(yr * yr + yi * yi)

    # Mask lane padding (classes >= n_class) so it cannot affect the max or the exp-sum.
    col = jax.lax.broadcasted_iota(jnp.int32, mod.shape, 1)
    mod = jnp.where(col < n_class, mod, jnp.float32(-1e30))

    # Numerically-stable log-softmax over the fully-resident class axis.
    m = jnp.max(mod, axis=1, keepdims=True)
    shifted = mod - m
    lse = jnp.log(jnp.sum(jnp.exp(shifted), axis=1, keepdims=True))
    out_ref[...] = (shifted - lse).astype(out_ref.dtype)


@functools.partial(jax.jit, static_argnames=("block_n", "matmul_dtype"))
def csmgc_forward(x_re, x_im, w_re, w_im, b_re, b_im, *,
                  block_n=None, matmul_dtype=jnp.float32):
    """x_{re,im}: [N, F], w_{re,im}: [C, F], b_{re,im}: [1, C] -> [N, C] log-probs (f32).

    matmul_dtype=jnp.bfloat16 trades a little precision for MXU throughput on v6e/v7x
    (accumulation and the softmax epilogue stay f32).
    """
    N, F = x_re.shape
    C = w_re.shape[0]

    bytes_mm = jnp.dtype(matmul_dtype).itemsize
    sub = 16 if bytes_mm < 4 else 8            # sublane multiple (bf16 packs 2 rows/sublane)
    Cp = _round_up(C, 128)                     # lane-dense class axis -> unmasked stores

    # ---- Pack weights / bias once (small arrays; x itself is never copied/concat'd) ----
    pad_c = ((0, 0), (0, Cp - C))
    w_ri = jnp.concatenate(
        [jnp.pad(w_re.T, pad_c), jnp.pad(w_im.T, pad_c)], axis=1).astype(matmul_dtype)  # [F, 2*Cp]
    b_ri = jnp.concatenate(
        [jnp.pad(b_re, pad_c), jnp.pad(b_im, pad_c)], axis=1).astype(jnp.float32)       # [1, 2*Cp]

    x_re = x_re.astype(matmul_dtype)
    x_im = x_im.astype(matmul_dtype)

    # ---- Per-generation tile sizing ----------------------------------------------------
    vmem_limit = _vmem_limit_bytes()
    if block_n is None:
        resident = 2 * (F * 2 * Cp * bytes_mm) + 2 * (2 * Cp * 4)       # W + bias (x2 buffers)
        per_row = 2 * (2 * F * bytes_mm) + 2 * (Cp * 4)                 # x_re+x_im tiles + out tile
        budget = int(0.8 * vmem_limit) - resident
        block_n = max(sub, min(2048, (budget // max(per_row, 1) // sub) * sub))

    TN = _round_up(min(block_n, _round_up(N, sub)), sub)
    N_pad = _round_up(N, TN)
    if N_pad != N:
        # Only copies x when N is not already a TN multiple (padded rows are sliced off).
        x_re = jnp.pad(x_re, ((0, N_pad - N), (0, 0)))
        x_im = jnp.pad(x_im, ((0, N_pad - N), (0, 0)))

    grid = (N_pad // TN,)

    cost = pl.CostEstimate(
        flops=2 * 2 * N_pad * F * 2 * Cp,                 # two [TN,F]@[F,2Cp] matmuls per tile
        transcendentals=3 * N_pad * Cp,                   # sqrt + exp (+ log)
        bytes_accessed=(2 * N_pad * F * bytes_mm          # x_re + x_im
                        + F * 2 * Cp * bytes_mm           # packed weight
                        + 2 * Cp * 4                      # packed bias
                        + N_pad * Cp * 4),                # output
    )

    out = pl.pallas_call(
        functools.partial(_csmgc_kernel, n_class=C),
        out_shape=jax.ShapeDtypeStruct((N_pad, Cp), jnp.float32),
        grid=grid,
        in_specs=[
            pl.BlockSpec((TN, F), lambda i: (i, 0)),         # x_re tiles (pipelined)
            pl.BlockSpec((TN, F), lambda i: (i, 0)),         # x_im tiles (pipelined)
            pl.BlockSpec((F, 2 * Cp), lambda i: (0, 0)),     # packed [Wr^T | Wi^T] (resident)
            pl.BlockSpec((1, 2 * Cp), lambda i: (0, 0)),     # packed bias (resident)
        ],
        out_specs=pl.BlockSpec((TN, Cp), lambda i: (i, 0)),
        compiler_params=pltpu.CompilerParams(
            dimension_semantics=("parallel",),               # 2 TCs on v7x; harmless elsewhere
            vmem_limit_bytes=vmem_limit,
        ),
        cost_estimate=cost,
    )(x_re, x_im, w_ri, b_ri)

    return out[:N, :C]


if __name__ == "__main__":
    # Small, module-consistent shapes: N samples, n_feat features, n_class classes.
    # N is deliberately not a multiple of the tile so the padded / multi-step paths run.
    N, n_feat, n_class = 20, 32, 8
    enable_bias = True

    key = jax.random.PRNGKey(0)
    kxr, kxi, kwr, kwi, kbr, kbi = jax.random.split(key, 6)

    x_re = jax.random.normal(kxr, (N, n_feat), dtype=jnp.float32)
    x_im = jax.random.normal(kxi, (N, n_feat), dtype=jnp.float32)

    # CLinear-style init: weight [n_class, n_feat], optional bias [n_class].
    scale = 1.0 / jnp.sqrt(jnp.float32(n_feat))
    w_re = jax.random.normal(kwr, (n_class, n_feat), dtype=jnp.float32) * scale
    w_im = jax.random.normal(kwi, (n_class, n_feat), dtype=jnp.float32) * scale
    if enable_bias:
        b_re = jax.random.normal(kbr, (1, n_class), dtype=jnp.float32) * scale
        b_im = jax.random.normal(kbi, (1, n_class), dtype=jnp.float32) * scale
    else:
        b_re = jnp.zeros((1, n_class), dtype=jnp.float32)
        b_im = jnp.zeros((1, n_class), dtype=jnp.float32)

    # Pure-JAX reference: complex linear -> |.| -> log_softmax over dim=1.
    xc = x_re + 1j * x_im
    wc = w_re + 1j * w_im
    bc = (b_re + 1j * b_im)[0]
    yc = xc @ wc.T + bc
    ref = jax.nn.log_softmax(jnp.abs(yc), axis=1)

    # f32 path, small explicit tile -> exercises a multi-step grid (3 tiles of 8 rows).
    out_small = csmgc_forward(x_re, x_im, w_re, w_im, b_re, b_im, block_n=8)
    jax.block_until_ready(out_small)
    assert out_small.shape == (N, n_class)
    assert jnp.allclose(out_small, ref, atol=1e-4, rtol=1e-4), "f32 multi-tile mismatch"

    # f32 path, auto-sized tile (per-generation VMEM budget).
    out_auto = csmgc_forward(x_re, x_im, w_re, w_im, b_re, b_im)
    jax.block_until_ready(out_auto)
    assert jnp.allclose(out_auto, ref, atol=1e-4, rtol=1e-4), "f32 auto-tile mismatch"

    # bf16-for-MXU path (v6e/v7x perf option): same kernel, looser tolerance.
    out_bf16 = csmgc_forward(x_re, x_im, w_re, w_im, b_re, b_im,
                             matmul_dtype=jnp.bfloat16)
    jax.block_until_ready(out_bf16)
    assert bool(jnp.all(jnp.isfinite(out_bf16)))
    assert float(jnp.max(jnp.abs(out_bf16 - ref))) < 0.1, "bf16 path drifted too far"

    print("KERNEL_OK")
</pallas_src>

<mosaic_0001>
module attributes {stable_mosaic.version = 11 : i64} {
  func.func @_csmgc_kernel(%arg0: i32, %arg1: memref<8x32xf32, #tpu.memory_space<vmem>>, %arg2: memref<8x32xf32, #tpu.memory_space<vmem>>, %arg3: memref<32x256xf32, #tpu.memory_space<vmem>>, %arg4: memref<1x256xf32, #tpu.memory_space<vmem>>, %arg5: memref<8x128xf32, #tpu.memory_space<vmem>>) attributes {dimension_semantics = [#tpu.dimension_semantics<parallel>], iteration_bounds = array<i64: 3>, scalar_prefetch = 0 : i64, scratch_operands = 0 : i64, tpu.core_type = #tpu.core_type<tc>, window_params = [{transform_indices = @transform_0, window_bounds = array<i64: 8, 32>}, {transform_indices = @transform_1, window_bounds = array<i64: 8, 32>}, {pipeline_mode = #tpu.pipeline_mode<synchronous>, transform_indices = @transform_2, window_bounds = array<i64: 32, 256>}, {pipeline_mode = #tpu.pipeline_mode<synchronous>, transform_indices = @transform_3, window_bounds = array<i64: 1, 256>}, {transform_indices = @transform_4, window_bounds = array<i64: 8, 128>}]} {
    %c0 = arith.constant 0 : index
    %c0_0 = arith.constant 0 : index
    %0 = vector.load %arg1[%c0, %c0_0] : memref<8x32xf32, #tpu.memory_space<vmem>>, vector<8x32xf32>
    %c0_1 = arith.constant 0 : index
    %c0_2 = arith.constant 0 : index
    %1 = vector.load %arg3[%c0_1, %c0_2] : memref<32x256xf32, #tpu.memory_space<vmem>>, vector<32x256xf32>
    %cst = arith.constant dense<0.000000e+00> : vector<8x256xf32>
    %2 = tpu.matmul %0, %1, %cst {dimension_numbers = #tpu.dot_dimension_numbers<[1], [0], [0], [1], [0, 0, 1, 1], [], []>} : vector<8x32xf32>, vector<32x256xf32>, vector<8x256xf32> -> vector<8x256xf32>
    %c0_3 = arith.constant 0 : index
    %c0_4 = arith.constant 0 : index
    %3 = vector.load %arg2[%c0_3, %c0_4] : memref<8x32xf32, #tpu.memory_space<vmem>>, vector<8x32xf32>
    %c0_5 = arith.constant 0 : index
    %c0_6 = arith.constant 0 : index
    %4 = vector.load %arg3[%c0_5, %c0_6] : memref<32x256xf32, #tpu.memory_space<vmem>>, vector<32x256xf32>
    %cst_7 = arith.constant dense<0.000000e+00> : vector<8x256xf32>
    %5 = tpu.matmul %3, %4, %cst_7 {dimension_numbers = #tpu.dot_dimension_numbers<[1], [0], [0], [1], [0, 0, 1, 1], [], []>} : vector<8x32xf32>, vector<32x256xf32>, vector<8x256xf32> -> vector<8x256xf32>
    %c0_8 = arith.constant 0 : index
    %c0_9 = arith.constant 0 : index
    %6 = vector.load %arg4[%c0_8, %c0_9] : memref<1x256xf32, #tpu.memory_space<vmem>>, vector<1x256xf32>
    %7 = vector.broadcast %6 : vector<1x256xf32> to vector<8x256xf32>
    %8 = arith.addf %2, %7 : vector<8x256xf32>
    %9 = vector.extract_strided_slice %8 {offsets = [0, 0], sizes = [8, 128], strides = [1, 1]} : vector<8x256xf32> to vector<8x128xf32>
    %10 = vector.extract_strided_slice %5 {offsets = [0, 128], sizes = [8, 128], strides = [1, 1]} : vector<8x256xf32> to vector<8x128xf32>
    %11 = arith.subf %9, %10 : vector<8x128xf32>
    %12 = vector.extract_strided_slice %8 {offsets = [0, 128], sizes = [8, 128], strides = [1, 1]} : vector<8x256xf32> to vector<8x128xf32>
    %13 = vector.extract_strided_slice %5 {offsets = [0, 0], sizes = [8, 128], strides = [1, 1]} : vector<8x256xf32> to vector<8x128xf32>
    %14 = arith.addf %12, %13 : vector<8x128xf32>
    %15 = arith.mulf %11, %11 : vector<8x128xf32>
    %16 = arith.mulf %14, %14 : vector<8x128xf32>
    %17 = arith.addf %15, %16 : vector<8x128xf32>
    %18 = math.sqrt %17 : vector<8x128xf32>
    %19 = tpu.iota {dimensions = array<i32: 1>} : vector<8x128xi32>
    %c8_i32 = arith.constant 8 : i32
    %20 = vector.broadcast %c8_i32 : i32 to vector<8x128xi32>
    %21 = arith.cmpi slt, %19, %20 : vector<8x128xi32>
    %cst_10 = arith.constant -1.000000e+30 : f32
    %22 = vector.broadcast %cst_10 : f32 to vector<8x128xf32>
    %23 = arith.select %21, %18, %22 : vector<8x128xi1>, vector<8x128xf32>
    %cst_11 = arith.constant dense<0xFF800000> : vector<8xf32>
    %24 = vector.multi_reduction <maximumf>, %23, %cst_11 [1] : vector<8x128xf32> to vector<8xf32>
    %25 = vector.shape_cast %24 : vector<8xf32> to vector<8x1xf32>
    %26 = vector.broadcast %25 : vector<8x1xf32> to vector<8x128xf32>
    %27 = arith.subf %23, %26 : vector<8x128xf32>
    %28 = math.exp %27 : vector<8x128xf32>
    %cst_12 = arith.constant dense<0.000000e+00> : vector<8xf32>
    %29 = vector.multi_reduction <add>, %28, %cst_12 [1] : vector<8x128xf32> to vector<8xf32>
    %30 = vector.shape_cast %29 : vector<8xf32> to vector<8x1xf32>
    %31 = math.log %30 : vector<8x1xf32>
    %32 = vector.broadcast %31 : vector<8x1xf32> to vector<8x128xf32>
    %33 = arith.subf %27, %32 : vector<8x128xf32>
    %c0_13 = arith.constant 0 : index
    %c0_14 = arith.constant 0 : index
    %34 = vector.load %arg5[%c0_13, %c0_14] : memref<8x128xf32, #tpu.memory_space<vmem>>, vector<8x128xf32>
    tpu.vector_store %arg5[%c0_13, %c0_14], %33 {strides = array<i32>} : memref<8x128xf32, #tpu.memory_space<vmem>>, vector<8x128xf32>,
    return
  }
  func.func @transform_0(%arg0: i32) -> (i32, i32) {
    %c0_i32 = arith.constant 0 : i32
    %c0_i32_0 = arith.constant 0 : i32
    return %arg0, %c0_i32 : i32, i32
  }
  func.func @transform_1(%arg0: i32) -> (i32, i32) {
    %c0_i32 = arith.constant 0 : i32
    %c0_i32_0 = arith.constant 0 : i32
    return %arg0, %c0_i32 : i32, i32
  }
  func.func @transform_2(%arg0: i32) -> (i32, i32) {
    %c0_i32 = arith.constant 0 : i32
    %c0_i32_0 = arith.constant 0 : i32
    %c0_i32_1 = arith.constant 0 : i32
    return %c0_i32, %c0_i32_0 : i32, i32
  }
  func.func @transform_3(%arg0: i32) -> (i32, i32) {
    %c0_i32 = arith.constant 0 : i32
    %c0_i32_0 = arith.constant 0 : i32
    %c0_i32_1 = arith.constant 0 : i32
    return %c0_i32, %c0_i32_0 : i32, i32
  }
  func.func @transform_4(%arg0: i32) -> (i32, i32) {
    %c0_i32 = arith.constant 0 : i32
    %c0_i32_0 = arith.constant 0 : i32
    return %arg0, %c0_i32 : i32, i32
  }
}

</mosaic_0001>

<bundles_post_ra>
// kernel: csmgc_forward.1
= control target key start
LH: loop header
LB: loop body
LE: loop exit
PB: predicated region body
PF: predicated region fallthrough
CT: control target
= control target key end

     0   :  { %s550_s15 = smov 0   ;;  %s602_s0 = inlined_call_operand.vmem [shape: f32[24,32], index: 0, kind: input, shape index: {}]   ;;  %s603_s1 = inlined_call_operand.vmem [shape: f32[24,32], index: 1, kind: input, shape index: {}]   ;;  %s604_s2 = inlined_call_operand.vmem [shape: f32[32,256], index: 2, kind: input, shape index: {}]   ;;  %s605_s3 = inlined_call_operand.vmem [shape: f32[1,256], index: 3, kind: input, shape index: {}]   ;;  %s606_s4 = inlined_call_operand.vmem [shape: f32[24,128], index: 4, kind: output, shape index: {}]  }
   0x1 LB: > { %s473_s16 = sadd.s32 4294967295, %s522_s15   ;;  %p477_p0 = scmp.ge.s32.totalorder %s522_s15, 1  ;;  %s522_s15 = sphi %s550_s15, %s14_s15  }
   0x2   : > { %p170_p1 = scmp.lt.s32.totalorder %s522_s15, 4 }
   0x4   : > { %p171_p2 = pnand %p477_p0, %p170_p1 }
   0x5   : > { %v212_v0 = vld [vmem:[%s604_s2 + $0x8] sm:$0xff] (!%p171_p2)  ;;  %v214_v1 = vld [vmem:[%s604_s2 + $0x18] sm:$0xff] (!%p171_p2)  ;;  %v211_v2 = vld [vmem:[%s604_s2] sm:$0xff] (!%p171_p2)  ;;  %p198_p3 = scmp.lt.s32.totalorder (!%p171_p2), %s473_s16, 2  ;;  %v524_v7 = vmov (!%p171_p2), 0.0   ;;  %vm220_vm0 = vcmask (!%p171_p2), 261120   ;;  %v297_v15 = vlaneseq (!%p171_p2) }
   0x6   : > { %174 = sbr.rel (%p171_p2) target bundleno = 569 (0x239), region = 36  ;;  %v485_v3 = vpack.c.bf16 (!%p171_p2), %v214_v1, %v212_v0  ;;  %v213_v4 = vld [vmem:[%s604_s2 + $0x10] sm:$0xff] (!%p171_p2)  ;;  %v216_v5 = vld [vmem:[%s604_s2 + $0x28] sm:$0xff] (!%p171_p2)  ;;  %v218_v6 = vld [vmem:[%s604_s2 + $0x38] sm:$0xff] (!%p171_p2)  ;;  %374 = vmatprep.mubr.f32.mxu1 (!%p171_p2), %v524_v7  ;;  %288 = vmatprep.mubr.f32.mxu0 (!%p171_p2), %v524_v7 }
   0x7   : > { %v487_v8 = vpack.c.bf16 (!%p171_p2), %v213_v4, %v211_v2  ;;  %v489_v9 = vpack.c.bf16 (!%p171_p2), %v218_v6, %v216_v5  ;;  %v215_v10 = vld [vmem:[%s604_s2 + $0x20] sm:$0xff] (!%p171_p2)  ;;  %v217_v11 = vld [vmem:[%s604_s2 + $0x30] sm:$0xff] (!%p171_p2)  ;;  %v298_v16 = vshrl.u32 (!%p171_p2), %v297_v15, 7  ;;  %v394_v33 = vand.u32 (!%p171_p2), 127, %v297_v15 }
   0x8   : > { %494 = vmatprep.subr.bf16.mxu1 (!%p171_p2), %v485_v3  ;;  %486 = vmatprep.subr.bf16.mxu0 (!%p171_p2), %v485_v3  ;;  %v491_v12 = vpack.c.bf16 (!%p171_p2), %v217_v11, %v215_v10  ;;  %v295_v18 = vld [vmem:[%s605_s3] sm:$0x3] (!%p171_p2) }
   0x9   : > { %496 = vmatpush1.bf16.msra.mxu1 (!%p171_p2), %v487_v8  ;;  %488 = vmatpush1.bf16.msra.mxu0 (!%p171_p2), %v487_v8  ;;  %v299_v17 = vsub.s32 (!%p171_p2), 0, %v298_v16  ;;  %v303_v19 = vsub.s32 (!%p171_p2), 1, %v298_v16  ;;  %vm395_vm2 = vcmp.lt.s32.totalorder (!%p171_p2), %v394_v33, 8 }
   0xa   : > { %498 = vmatprep.subr.bf16.mxu1 (!%p171_p2), %v489_v9  ;;  %490 = vmatprep.subr.bf16.mxu0 (!%p171_p2), %v489_v9 }
   0xb   : > { %v300_v20 = vrot.slane (!%p171_p2), %v295_v18, %v299_v17  ;;  %v304_v21 = vrot.slane (!%p171_p2), %v295_v18, %v303_v19 }
   0xd   : > { %s608_s16 = smov (!%p198_p3, %s473_s16), 2  ;;  %500 = vmatpush1.bf16.msra.mxu1 %v491_v12  ;;  %492 = vmatpush1.bf16.msra.mxu0 %v491_v12 }
   0xe   : > { %s582_s7 = sshll.u32 %s608_s16, 3 }
   0xf   : > { %s201_s10 = scalar_lea.vmem %s602_s0, %s582_s7  ;;  %s205_s13 = scalar_lea.vmem %s603_s1, %s582_s7 }
  0x10   : > { %v210_v13 = vld [vmem:[%s201_s10] sm:$0xff]  ;;  %s209_s19 = scalar_lea.vmem %s606_s4, %s582_s7 }
  0x11   : > { %v219_v14 = vld [vmem:[%s205_s13] sm:$0xff]  ;;  %482 = vmatmul.mubr.msk.f32.vlgmr.msra.gmra.mrb[0].mxu1 %vm220_vm0, %v210_v13 }
  0x12   : > { %481 = vmatmul.mubr.msk.f32.vlgmr.msra.gmra.mrb[0].mxu0 %vm220_vm0, %v219_v14 }
  0xe4   : > { %v376_v22 = vpop.f32.mrb[0].mxu1 }
  0xe5   : > { %v290_v23 = vpop.f32.mrb[0].mxu0  ;;  %v377_v24 = vadd.f32 %v376_v22, %v300_v20  ;;  %v378_v25 = vpop.f32.mrb[1].mxu1 }
  0xe6   : > { %v292_v26 = vpop.f32.mrb[1].mxu0  ;;  %v379_v27 = vadd.f32 %v378_v25, %v304_v21 }
  0xe7   : > { %v381_v28 = vsub.f32 %v377_v24, %v292_v26 }
  0xe8   : > { %v382_v29 = vadd.f32 %v379_v27, %v290_v23 }
  0xe9   : > { %v383_v30 = vmul.f32 %v381_v28, %v381_v28 }
  0xea   : > { %v384_v31 = vmul.f32 %v382_v29, %v382_v29 }
  0xec   : > { %v385_v32 = vadd.f32 %v384_v31, %v383_v30 }
  0xee   : > { %510 = vrsqrt.f32 %v385_v32  ;;  %vm388_vm1 = vcmp.eq.f32.partialorder %v385_v32, inf  ;;  %v391_v36 = vand.u32 2147483648, %v385_v32  ;;  %vm390_vm3 = vcmp.eq.f32.partialorder %v385_v32, 0.0 }
  0xf8   : > { %v511_v34 = vpop.eup %510 }
  0xf9   : > { %v387_v35 = vmul.f32 %v511_v34, %v385_v32 }
  0xfb   : > { %v389_v37 = vsel %vm388_vm1, %v385_v32, %v387_v35 }
  0xfc   : > { %v392_v38 = vsel %vm390_vm3, %v391_v36, %v389_v37 }
  0xfd   : > { %v396_v39 = vsel %vm395_vm2, %v392_v38, -1e+30 }
  0xfe   : > { %397 = vmax.xlane.f32.xlu0 %v396_v39 }
 0x18b   : > { %v398_v40 = vpop.xlane.xlu0 %397 }
 0x18c   : > { %v399_v41 = vsub.f32 %v396_v39, %v398_v40 }
 0x18e   : > { %v400_v42 = vmul.f32 1.442695, %v399_v41 }
 0x190   : > { %512 = vpow2.f32 %v400_v42 }
 0x19a   : > { %v513_v43 = vpop.eup %512 }
 0x19b   : > { %402 = vadd.xlane.f32.xlu0 %v513_v43 }
 0x228   : > { %v403_v44 = vpop.xlane.xlu0 %402 }
 0x229   : > { %514 = vlog2.f32 %v403_v44 }
 0x233   : > { %v515_v45 = vpop.eup %514 }
 0x234   : > { %v405_v46 = vmul.f32 0.6931472, %v515_v45 }
 0x236   : > { %v406_v47 = vsub.f32 %v399_v41, %v405_v46 }
 0x238   : > { %407 = vst [vmem:[%s209_s19] sm:$0xff] %v406_v47 }
 0x239 PF: > { %s14_s15 = sadd.s32 1, %s522_s15  }
 0x23a   : > { %p11_p4 = scmp.ge.s32.totalorder %s14_s15, 5  }
 0x23c   :  { %13 = sbr.rel (!%p11_p4) target bundleno = 1 (0x1), region = 69 }

</bundles_post_ra>
